<compile_context>
chip_gen: v5e
topology: v5e:2x2
jax: 0.10.0
libtpu: 0.0.40
codegen_flags: <defaults>
</compile_context>

<pallas_src>
import functools

import jax
import jax.numpy as jnp
from jax.experimental import pallas as pl
from jax.experimental.pallas import tpu as pltpu

_DOT_PRECISION = jax.lax.Precision.HIGHEST


def _round_up(x, m):
    return (x + m - 1) // m * m


def senet_kernel(x_ref, w1p_ref, w2p_ref, o_ref):
    # x_ref:   (TB, F*D)  lane-dense input tile (pipelined over batch)
    # w1p_ref: (F*D, R)   mean folded into the first excitation linear
    # w2p_ref: (R, F*D)   gate expansion folded into the second excitation linear
    # o_ref:   (TB, F*D)
    x = x_ref[...]

    # Squeeze + first excitation linear in one MXU matmul.
    h = jnp.maximum(
        jnp.dot(x, w1p_ref[...], preferred_element_type=jnp.float32,
                precision=_DOT_PRECISION),
        0.0)                                                        # (TB, R)

    # Second excitation linear + lane-dense gate expansion in one MXU matmul.
    gate = jnp.maximum(
        jnp.dot(h.astype(x.dtype), w2p_ref[...],
                preferred_element_type=jnp.float32,
                precision=_DOT_PRECISION),
        0.0)                                                        # (TB, FD)

    # Re-weight: full-lane VPU multiply, unmasked store.
    o_ref[...] = (x * gate).astype(o_ref.dtype)


@functools.partial(jax.jit, static_argnames=("tb",))
def senet_layer(x, w1, w2, *, tb=4096):
    """x: (B, F, D); w1: (F, R); w2: (R, F)  ->  (B, F, D)."""
    B, F, D = x.shape
    R = w1.shape[1]
    FD = F * D
    itemsize = jnp.dtype(x.dtype).itemsize

    # ---- Fold mean + gate-expansion block-diagonal helpers into the weights
    #      (exact; see header).  Done once outside the kernel, tiny matmuls.
    eye = jnp.eye(F, dtype=jnp.float32)
    avg = jnp.repeat(eye, D, axis=0) / D                      # (FD, F), entries 1/D
    exp = jnp.repeat(eye, D, axis=1)                          # (F, FD), 0/1
    w1p = (avg @ w1.astype(jnp.float32)).astype(x.dtype)      # (FD, R)
    w2p = (w2.astype(jnp.float32) @ exp).astype(x.dtype)      # (R, FD)

    # Lane-dense 2D layout (reshape of a contiguous array: metadata only).
    x2d = x.reshape(B, FD)

    # Pad batch only to a sublane multiple (<= 7 rows).  The common case
    # B % 8 == 0 incurs no pad/slice copies at all; an uneven last TB-tile is
    # handled by the pipeline's clipped DMA (grid = cdiv below).
    B_pad = _round_up(B, 8)
    if B_pad != B:
        x2d = jnp.pad(x2d, ((0, B_pad - B), (0, 0)))

    # Batch tile: multiple of 8 sublanes, capped by
    #   (a) the requested tb,
    #   (b) a VMEM budget counting double-buffered in + out tiles plus the
    #       (TB, FD) f32 gate temp (~6 "rows" of bytes per row, with margin),
    #   (c) >= 4 grid steps when the batch allows it (v7x: 2 TensorCores get
    #       work via the "parallel" axis),
    #   (d) the (padded) batch itself.
    vmem_limit = 32 * 1024 * 1024                  # explicit scoped-VMEM request
    bytes_per_row = 6 * FD * max(itemsize, 4)      # gate/intermediates are f32
    max_rows = max(8, ((vmem_limit * 3 // 4) // bytes_per_row) // 8 * 8)
    min_steps_cap = max(8, _round_up(pl.cdiv(B_pad, 4), 8))
    TB = max(8, min(_round_up(tb, 8), max_rows, min_steps_cap, B_pad))

    grid = (pl.cdiv(B_pad, TB),)
    flops = 4 * B_pad * FD * R + 2 * B_pad * FD
    bytes_accessed = (2 * B_pad * FD + FD * R + R * FD) * itemsize

    out2d = pl.pallas_call(
        senet_kernel,
        out_shape=jax.ShapeDtypeStruct((B_pad, FD), x.dtype),
        grid_spec=pl.GridSpec(
            grid=grid,
            in_specs=[
                pl.BlockSpec((TB, FD), lambda i: (i, 0)),   # x tile (pipelined)
                pl.BlockSpec((FD, R), lambda i: (0, 0)),    # W1p (VMEM-resident)
                pl.BlockSpec((R, FD), lambda i: (0, 0)),    # W2p (VMEM-resident)
            ],
            out_specs=pl.BlockSpec((TB, FD), lambda i: (i, 0)),
        ),
        compiler_params=pltpu.CompilerParams(
            dimension_semantics=("parallel",),              # batch tiles independent
            vmem_limit_bytes=vmem_limit,
        ),
        cost_estimate=pl.CostEstimate(
            flops=flops, transcendentals=0, bytes_accessed=bytes_accessed
        ),
    )(x2d, w1p, w2p)

    # Slice only when B was not a sublane multiple (one small extra copy).
    if B_pad != B:
        out2d = out2d[:B]
    return out2d.reshape(B, F, D)


def reference_senet(x, w1, w2):
    z = jnp.mean(x, axis=-1)
    h = jnp.maximum(z @ w1, 0.0)
    a = jnp.maximum(h @ w2, 0.0)
    return x * a[:, :, None]


if __name__ == "__main__":
    # num_fields=8, reduction_ratio=3 -> reduced_size = max(1, int(8/3)) = 2.
    B, F, D = 2, 8, 16
    reduction_ratio = 3
    R = max(1, int(F / reduction_ratio))

    key = jax.random.PRNGKey(0)
    kx, k1, k2 = jax.random.split(key, 3)

    x = jax.random.normal(kx, (B, F, D), dtype=jnp.float32)
    # Deterministic stand-in for nn.Linear's init, stored pre-transposed:
    # W1 (F, R), W2 (R, F).
    w1 = jax.random.normal(k1, (F, R), dtype=jnp.float32) * (1.0 / jnp.sqrt(F))
    w2 = jax.random.normal(k2, (R, F), dtype=jnp.float32) * (1.0 / jnp.sqrt(R))

    out = senet_layer(x, w1, w2)
    out = jax.block_until_ready(out)

    ref = reference_senet(x, w1, w2)
    assert out.shape == (B, F, D)
    assert jnp.allclose(out, ref, atol=1e-4, rtol=1e-4), "mismatch vs reference"

    print("KERNEL_OK")
</pallas_src>

<mosaic_0001>
module attributes {stable_mosaic.version = 11 : i64} {
  func.func @senet_kernel(%arg0: i32, %arg1: memref<8x128xf32, #tpu.memory_space<vmem>>, %arg2: memref<128x2xf32, #tpu.memory_space<vmem>>, %arg3: memref<2x128xf32, #tpu.memory_space<vmem>>, %arg4: memref<8x128xf32, #tpu.memory_space<vmem>>) attributes {dimension_semantics = [#tpu.dimension_semantics<parallel>], iteration_bounds = array<i64: 1>, scalar_prefetch = 0 : i64, scratch_operands = 0 : i64, tpu.core_type = #tpu.core_type<tc>, window_params = [{transform_indices = @transform_0, window_bounds = array<i64: 8, 128>}, {pipeline_mode = #tpu.pipeline_mode<synchronous>, transform_indices = @transform_1, window_bounds = array<i64: 128, 2>}, {pipeline_mode = #tpu.pipeline_mode<synchronous>, transform_indices = @transform_2, window_bounds = array<i64: 2, 128>}, {transform_indices = @transform_3, window_bounds = array<i64: 8, 128>}]} {
    %c0 = arith.constant 0 : index
    %c0_0 = arith.constant 0 : index
    %0 = vector.load %arg1[%c0, %c0_0] : memref<8x128xf32, #tpu.memory_space<vmem>>, vector<8x128xf32>
    %c0_1 = arith.constant 0 : index
    %c0_2 = arith.constant 0 : index
    %1 = vector.load %arg2[%c0_1, %c0_2] : memref<128x2xf32, #tpu.memory_space<vmem>>, vector<128x2xf32>
    %cst = arith.constant dense<0.000000e+00> : vector<8x2xf32>
    %2 = tpu.matmul %0, %1, %cst {dimension_numbers = #tpu.dot_dimension_numbers<[1], [0], [0], [1], [0, 0, 1, 1], [], []>, precision = #tpu.contract_precision<fp32>} : vector<8x128xf32>, vector<128x2xf32>, vector<8x2xf32> -> vector<8x2xf32>
    %cst_3 = arith.constant 0.000000e+00 : f32
    %3 = vector.broadcast %cst_3 : f32 to vector<8x2xf32>
    %4 = arith.maximumf %2, %3 : vector<8x2xf32>
    %c0_4 = arith.constant 0 : index
    %c0_5 = arith.constant 0 : index
    %5 = vector.load %arg3[%c0_4, %c0_5] : memref<2x128xf32, #tpu.memory_space<vmem>>, vector<2x128xf32>
    %cst_6 = arith.constant dense<0.000000e+00> : vector<8x128xf32>
    %6 = tpu.matmul %4, %5, %cst_6 {dimension_numbers = #tpu.dot_dimension_numbers<[1], [0], [0], [1], [0, 0, 1, 1], [], []>, precision = #tpu.contract_precision<fp32>} : vector<8x2xf32>, vector<2x128xf32>, vector<8x128xf32> -> vector<8x128xf32>
    %cst_7 = arith.constant 0.000000e+00 : f32
    %7 = vector.broadcast %cst_7 : f32 to vector<8x128xf32>
    %8 = arith.maximumf %6, %7 : vector<8x128xf32>
    %9 = arith.mulf %0, %8 : vector<8x128xf32>
    %c0_8 = arith.constant 0 : index
    %c0_9 = arith.constant 0 : index
    %10 = vector.load %arg4[%c0_8, %c0_9] : memref<8x128xf32, #tpu.memory_space<vmem>>, vector<8x128xf32>
    tpu.vector_store %arg4[%c0_8, %c0_9], %9 {strides = array<i32>} : memref<8x128xf32, #tpu.memory_space<vmem>>, vector<8x128xf32>,
    return
  }
  func.func @transform_0(%arg0: i32) -> (i32, i32) {
    %c0_i32 = arith.constant 0 : i32
    %c0_i32_0 = arith.constant 0 : i32
    return %arg0, %c0_i32 : i32, i32
  }
  func.func @transform_1(%arg0: i32) -> (i32, i32) {
    %c0_i32 = arith.constant 0 : i32
    %c0_i32_0 = arith.constant 0 : i32
    %c0_i32_1 = arith.constant 0 : i32
    return %c0_i32, %c0_i32_0 : i32, i32
  }
  func.func @transform_2(%arg0: i32) -> (i32, i32) {
    %c0_i32 = arith.constant 0 : i32
    %c0_i32_0 = arith.constant 0 : i32
    %c0_i32_1 = arith.constant 0 : i32
    return %c0_i32, %c0_i32_0 : i32, i32
  }
  func.func @transform_3(%arg0: i32) -> (i32, i32) {
    %c0_i32 = arith.constant 0 : i32
    %c0_i32_0 = arith.constant 0 : i32
    return %arg0, %c0_i32 : i32, i32
  }
}

</mosaic_0001>

<bundles_post_ra>
// kernel: senet_layer.1
= control target key start
LH: loop header
LB: loop body
LE: loop exit
PB: predicated region body
PF: predicated region fallthrough
CT: control target
= control target key end

     0   :  { %vm378_vm0 = vcmask 1041408   ;;  %vm374_vm1 = vcmask 15360   ;;  %s855_s1 = inlined_call_operand.vmem [shape: f32[128,2], index: 1, kind: input, shape index: {}]   ;;  %s856_s0 = inlined_call_operand.vmem [shape: f32[8,128], index: 0, kind: input, shape index: {}]   ;;  %s857_s2 = inlined_call_operand.vmem [shape: f32[2,128], index: 2, kind: input, shape index: {}]   ;;  %s858_s3 = inlined_call_operand.vmem [shape: f32[8,128], index: 3, kind: output, shape index: {}]  }
   0x1   :  { %v30_v0 = vld [vmem:[%s855_s1 + $0x78] sm:$0xff]  ;;  %v29_v1 = vld [vmem:[%s855_s1 + $0x70] sm:$0xff]  ;;  %v28_v2 = vld [vmem:[%s855_s1 + $0x68] sm:$0xff] }
   0x2   :  { %v564_v3 = vand.u32 4294901760, %v30_v0  ;;  %v566_v4 = vand.u32 4294901760, %v29_v1  ;;  %v568_v5 = vand.u32 4294901760, %v28_v2  ;;  %v27_v6 = vld [vmem:[%s855_s1 + $0x60] sm:$0xff]  ;;  %v26_v7 = vld [vmem:[%s855_s1 + $0x58] sm:$0xff]  ;;  %v25_v8 = vld [vmem:[%s855_s1 + $0x50] sm:$0xff] }
   0x3   :  { %v579_v9 = vand.u32 4294901760, %v27_v6  ;;  %v581_v10 = vand.u32 4294901760, %v26_v7  ;;  %v583_v11 = vand.u32 4294901760, %v25_v8  ;;  %v24_v12 = vld [vmem:[%s855_s1 + $0x48] sm:$0xff]  ;;  %v23_v13 = vld [vmem:[%s855_s1 + $0x40] sm:$0xff]  ;;  %v22_v18 = vld [vmem:[%s855_s1 + $0x38] sm:$0xff] }
   0x4   :  { %32 = vmatpush.msra.mxu0 %v564_v3  ;;  %v593_v14 = vsub.f32 %v30_v0, %v564_v3  ;;  %v596_v15 = vsub.f32 %v29_v1, %v566_v4  ;;  %v599_v16 = vsub.f32 %v28_v2, %v568_v5  ;;  %v601_v17 = vand.u32 4294901760, %v24_v12  ;;  %228 = vmatpush.msra.mxu3 %v564_v3  ;;  %v21_v26 = vld [vmem:[%s855_s1 + $0x30] sm:$0xff]  ;;  %v20_v36 = vld [vmem:[%s855_s1 + $0x28] sm:$0xff]  ;;  %v19_v42 = vld [vmem:[%s855_s1 + $0x20] sm:$0xff] }
   0x5   :  { %v608_v19 = vsub.f32 %v27_v6, %v579_v9  ;;  %v611_v20 = vsub.f32 %v26_v7, %v581_v10  ;;  %v614_v21 = vsub.f32 %v25_v8, %v583_v11  ;;  %v620_v25 = vand.u32 4294901760, %v23_v13  ;;  %v18_v47 = vld [vmem:[%s855_s1 + $0x18] sm:$0xff]  ;;  %v17_v55 = vld [vmem:[%s855_s1 + $0x10] sm:$0xff]  ;;  %v16_v60 = vld [vmem:[%s855_s1 + $0x8] sm:$0xff] }
   0x6   :  { %34 = vmatpush.msra.mxu0 %v566_v4  ;;  %v74_v22 = vand.u32 4294901760, %v593_v14  ;;  %v80_v23 = vand.u32 4294901760, %v596_v15  ;;  %v86_v24 = vand.u32 4294901760, %v599_v16  ;;  %175 = vmatpush.msra.mxu2 %v593_v14  ;;  %v627_v28 = vand.u32 4294901760, %v22_v18  ;;  %v15_v1 = vld [vmem:[%s855_s1] sm:$0xff] }
   0x7   :  { %v92_v27 = vand.u32 4294901760, %v608_v19  ;;  %v630_v29 = vsub.f32 %v24_v12, %v601_v17  ;;  %230 = vmatpush.msra.mxu3 %v566_v4  ;;  %v98_v33 = vand.u32 4294901760, %v611_v20  ;;  %v104_v34 = vand.u32 4294901760, %v614_v21  ;;  %v730_v7 = vld [vmem:[%s856_s0] sm:$0xff] }
   0x8   :  { %36 = vmatpush.msra.mxu0 %v568_v5  ;;  %v75_v30 = vsub.f32 %v593_v14, %v74_v22  ;;  %v81_v31 = vsub.f32 %v596_v15, %v80_v23  ;;  %v87_v32 = vsub.f32 %v599_v16, %v86_v24  ;;  %178 = vmatpush.msra.mxu2 %v596_v15  ;;  %v646_v35 = vand.u32 4294901760, %v21_v26 }
   0x9   :  { %232 = vmatpush.msra.mxu3 %v568_v5  ;;  %v93_v39 = vsub.f32 %v608_v19, %v92_v27  ;;  %v657_v40 = vsub.f32 %v23_v13, %v620_v25  ;;  %v110_v41 = vand.u32 4294901760, %v630_v29  ;;  %v99_v44 = vsub.f32 %v611_v20, %v98_v33 }
   0xa   :  { %v76_v37 = vand.u32 4294901760, %v75_v30  ;;  %38 = vmatpush.msra.mxu0 %v579_v9  ;;  %v82_v38 = vand.u32 4294901760, %v81_v31  ;;  %181 = vmatpush.msra.mxu2 %v599_v16  ;;  %v88_v43 = vand.u32 4294901760, %v87_v32  ;;  %v669_v45 = vand.u32 4294901760, %v20_v36 }
   0xb   :  { %234 = vmatpush.msra.mxu3 %v579_v9  ;;  %v672_v46 = vsub.f32 %v22_v18, %v627_v28  ;;  %v105_v48 = vsub.f32 %v614_v21, %v104_v34  ;;  %v94_v49 = vand.u32 4294901760, %v93_v39  ;;  %v116_v50 = vand.u32 4294901760, %v657_v40 }
   0xc   :  { %77 = vmatpush.msra.mxu1 %v76_v37  ;;  %40 = vmatpush.msra.mxu0 %v581_v10  ;;  %v684_v51 = vand.u32 4294901760, %v19_v42  ;;  %v687_v52 = vsub.f32 %v21_v26, %v646_v35  ;;  %v111_v53 = vsub.f32 %v630_v29, %v110_v41  ;;  %v692_v54 = vand.u32 4294901760, %v18_v47 }
   0xd   :  { %184 = vmatpush.msra.mxu2 %v608_v19  ;;  %236 = vmatpush.msra.mxu3 %v581_v10  ;;  %v100_v56 = vand.u32 4294901760, %v99_v44  ;;  %v122_v57 = vand.u32 4294901760, %v672_v46  ;;  %v702_v58 = vsub.f32 %v20_v36, %v669_v45  ;;  %v106_v59 = vand.u32 4294901760, %v105_v48 }
   0xe   :  { %83 = vmatpush.msra.mxu1 %v82_v38  ;;  %42 = vmatpush.msra.mxu0 %v583_v11  ;;  %v117_v61 = vsub.f32 %v657_v40, %v116_v50  ;;  %v128_v62 = vand.u32 4294901760, %v687_v52  ;;  %v714_v63 = vand.u32 4294901760, %v17_v55  ;;  %v717_v0 = vsub.f32 %v19_v42, %v684_v51 }
   0xf   :  { %187 = vmatpush.msra.mxu2 %v611_v20  ;;  %238 = vmatpush.msra.mxu3 %v583_v11  ;;  %v112_v2 = vand.u32 4294901760, %v111_v53  ;;  %v723_v6 = vsub.f32 %v18_v47, %v692_v54  ;;  %v123_v8 = vsub.f32 %v672_v46, %v122_v57  ;;  %v134_v12 = vand.u32 4294901760, %v702_v58 }
  0x10   :  { %89 = vmatpush.msra.mxu1 %v88_v43  ;;  %44 = vmatpush.msra.mxu0 %v601_v17  ;;  %v737_v13 = vand.u32 4294901760, %v16_v60  ;;  %v740_v18 = vand.u32 4294901760, %v730_v7  ;;  %v742_v26 = vand.u32 4294901760, %v15_v1  ;;  %v118_v30 = vand.u32 4294901760, %v117_v61 }
  0x11   :  { %190 = vmatpush.msra.mxu2 %v614_v21  ;;  %240 = vmatpush.msra.mxu3 %v601_v17  ;;  %v129_v31 = vsub.f32 %v687_v52, %v128_v62  ;;  %v140_v32 = vand.u32 4294901760, %v717_v0  ;;  %v752_v36 = vsub.f32 %v17_v55, %v714_v63  ;;  %v146_v37 = vand.u32 4294901760, %v723_v6 }
  0x12   :  { %95 = vmatpush.msra.mxu1 %v94_v49  ;;  %46 = vmatpush.msra.mxu0 %v620_v25  ;;  %v124_v38 = vand.u32 4294901760, %v123_v8  ;;  %v135_v39 = vsub.f32 %v702_v58, %v134_v12  ;;  %v762_v42 = vsub.f32 %v16_v60, %v737_v13  ;;  %v64_v43 = vsub.f32 %v730_v7, %v740_v18 }
  0x13   :  { %193 = vmatpush.msra.mxu2 %v630_v29  ;;  %242 = vmatpush.msra.mxu3 %v620_v25  ;;  %v130_v44 = vand.u32 4294901760, %v129_v31  ;;  %v141_v47 = vsub.f32 %v717_v0, %v140_v32  ;;  %v152_v48 = vand.u32 4294901760, %v752_v36  ;;  %v774_v49 = vsub.f32 %v15_v1, %v742_v26 }
  0x14   :  { %101 = vmatpush.msra.mxu1 %v100_v56  ;;  %48 = vmatpush.msra.mxu0 %v627_v28  ;;  %v136_v53 = vand.u32 4294901760, %v135_v39  ;;  %v147_v55 = vsub.f32 %v723_v6, %v146_v37  ;;  %v158_v56 = vand.u32 4294901760, %v762_v42 }
  0x15   :  { %196 = vmatpush.msra.mxu2 %v657_v40  ;;  %244 = vmatpush.msra.mxu3 %v627_v28  ;;  %v142_v60 = vand.u32 4294901760, %v141_v47  ;;  %v153_v61 = vsub.f32 %v752_v36, %v152_v48  ;;  %v164_v1 = vand.u32 4294901760, %v774_v49 }
  0x16   :  { %107 = vmatpush.msra.mxu1 %v106_v59  ;;  %50 = vmatpush.msra.mxu0 %v646_v35  ;;  %v65_v59 = vand.u32 4294901760, %v64_v43  ;;  %v159_v8 = vsub.f32 %v762_v42, %v158_v56 }
  0x17   :  { %199 = vmatpush.msra.mxu2 %v672_v46  ;;  %246 = vmatpush.msra.mxu3 %v646_v35  ;;  %v154_v31 = vand.u32 4294901760, %v153_v61 }
  0x18   :  { %113 = vmatpush.msra.mxu1 %v112_v2  ;;  %52 = vmatpush.msra.mxu0 %v669_v45  ;;  %v148_v2 = vand.u32 4294901760, %v147_v55  ;;  %v160_v39 = vand.u32 4294901760, %v159_v8 }
  0x19   :  { %202 = vmatpush.msra.mxu2 %v687_v52  ;;  %248 = vmatpush.msra.mxu3 %v669_v45 }
  0x1a   :  { %119 = vmatpush.msra.mxu1 %v118_v30  ;;  %54 = vmatpush.msra.mxu0 %v684_v51  ;;  %v66_v30 = vsub.f32 %v64_v43, %v65_v59 }
  0x1b   :  { %205 = vmatpush.msra.mxu2 %v702_v58  ;;  %250 = vmatpush.msra.mxu3 %v684_v51 }
  0x1c   :  { %125 = vmatpush.msra.mxu1 %v124_v38  ;;  %56 = vmatpush.msra.mxu0 %v692_v54  ;;  %v165_v38 = vsub.f32 %v774_v49, %v164_v1 }
  0x1d   :  { %208 = vmatpush.msra.mxu2 %v717_v0  ;;  %252 = vmatpush.msra.mxu3 %v692_v54 }
  0x1e   :  { %131 = vmatpush.msra.mxu1 %v130_v44  ;;  %58 = vmatpush.msra.mxu0 %v714_v63  ;;  %v67_v44 = vand.u32 4294901760, %v66_v30  ;;  %v166_v47 = vand.u32 4294901760, %v165_v38 }
  0x1f   :  { %211 = vmatpush.msra.mxu2 %v723_v6  ;;  %254 = vmatpush.msra.mxu3 %v714_v63 }
  0x20   :  { %137 = vmatpush.msra.mxu1 %v136_v53  ;;  %60 = vmatpush.msra.mxu0 %v737_v13 }
  0x21   :  { %214 = vmatpush.msra.mxu2 %v752_v36  ;;  %256 = vmatpush.msra.mxu3 %v737_v13 }
  0x22   :  { %143 = vmatpush.msra.mxu1 %v142_v60  ;;  %62 = vmatpush.msra.mxu0 %v742_v26 }
  0x23   :  { %217 = vmatpush.msra.mxu2 %v762_v42  ;;  %258 = vmatpush.msra.mxu3 %v742_v26 }
  0x24   :  { %269 = vmatpush.msrb.mxu0 %v74_v22  ;;  %149 = vmatpush.msra.mxu1 %v148_v2 }
  0x25   :  { %220 = vmatpush.msra.mxu2 %v774_v49  ;;  %262 = vmatmul.f32.vlgmr.msra.gmra.mxu3 %v65_v59 }
  0x26   :  { %273 = vmatpush.msrb.mxu0 %v80_v23  ;;  %155 = vmatpush.msra.mxu1 %v154_v31 }
  0x27   :  { %223 = vmatmul.f32.vlgmr.msra.gmra.mxu2 %v64_v43  ;;  %68 = vmatmul.f32.vlgmr.msra.gmra.mxu0 %v67_v44 }
  0x28   :  { %277 = vmatpush.msrb.mxu0 %v86_v24  ;;  %161 = vmatpush.msra.mxu1 %v160_v39 }
  0x2a   :  { %281 = vmatpush.msrb.mxu0 %v92_v27  ;;  %167 = vmatpush.msra.mxu1 %v166_v47 }
  0x2b   :  { %169 = vmatmul.f32.vlgmr.msra.gmra.mxu1 %v740_v18 }
  0x2c   :  { %336 = vmatpush.msrb.mxu1 %v564_v3  ;;  %285 = vmatpush.msrb.mxu0 %v98_v33  ;;  %v373_v3 = vld [vmem:[%s857_s2] sm:$0x3] }
  0x2e   :  { %338 = vmatpush.msrb.mxu1 %v566_v4  ;;  %289 = vmatpush.msrb.mxu0 %v104_v34  ;;  %v380_v4 = vsel %vm378_vm0, %v373_v3, 0 }
  0x30   :  { %340 = vmatpush.msrb.mxu1 %v568_v5  ;;  %293 = vmatpush.msrb.mxu0 %v110_v41  ;;  %v397_v5 = vand.u32 4294901760, %v380_v4 }
  0x32   :  { %342 = vmatpush.msrb.mxu1 %v579_v9  ;;  %297 = vmatpush.msrb.mxu0 %v116_v50  ;;  %v424_v9 = vsub.f32 %v380_v4, %v397_v5 }
  0x33   :  { %398 = vmatpush.msrb.mxu2 %v397_v5 }
  0x34   :  { %344 = vmatpush.msrb.mxu1 %v581_v10  ;;  %301 = vmatpush.msrb.mxu0 %v122_v57  ;;  %v425_v10 = vand.u32 4294901760, %v424_v9 }
  0x35   :  { %451 = vmatpush.msra.mxu2 %v424_v9 }
  0x36   :  { %346 = vmatpush.msrb.mxu1 %v583_v11  ;;  %305 = vmatpush.msrb.mxu0 %v128_v62  ;;  %v426_v11 = vsub.f32 %v424_v9, %v425_v10 }
  0x38   :  { %348 = vmatpush.msrb.mxu1 %v601_v17  ;;  %309 = vmatpush.msrb.mxu0 %v134_v12  ;;  %v427_v14 = vand.u32 4294901760, %v426_v11 }
  0x3a   :  { %350 = vmatpush.msrb.mxu1 %v620_v25  ;;  %313 = vmatpush.msrb.mxu0 %v140_v32 }
  0x3b   :  { %428 = vmatpush.msrb.mxu3 %v427_v14 }
  0x3c   :  { %352 = vmatpush.msrb.mxu1 %v627_v28  ;;  %317 = vmatpush.msrb.mxu0 %v146_v37 }
  0x3d   :  { %474 = vmatpush.msra.mxu3 %v397_v5 }
  0x3e   :  { %354 = vmatpush.msrb.mxu1 %v646_v35  ;;  %321 = vmatpush.msrb.mxu0 %v152_v48 }
  0x40   :  { %356 = vmatpush.msrb.mxu1 %v669_v45  ;;  %325 = vmatpush.msrb.mxu0 %v158_v56 }
  0x42   :  { %358 = vmatpush.msrb.mxu1 %v684_v51  ;;  %329 = vmatpush.msrb.mxu0 %v164_v1 }
  0x43   :  { %331 = vmatmul.f32.vlgmr.msrb.gmra.mxu0 %v740_v18 }
  0x44   :  { %360 = vmatpush.msrb.mxu1 %v692_v54 }
  0x46   :  { %362 = vmatpush.msrb.mxu1 %v714_v63 }
  0x48   :  { %364 = vmatpush.msrb.mxu1 %v737_v13 }
  0x4a   :  { %366 = vmatpush.msrb.mxu1 %v742_v26 }
  0x4b   :  { %368 = vmatmul.f32.vlgmr.msrb.gmra.mxu1 %v740_v18 }
  0xa4   :  { %v69_v16 = vpop.f32.mrf.mxu0 }
  0xa8   :  { %v170_v15 = vpop.f32.mrf.mxu1  ;;  %v263_v21 = vpop.f32.mrf.mxu3 }
  0xa9   :  { %v171_v17 = vadd.f32 %v170_v15, %v69_v16 }
  0xaa   :  { %v224_v19 = vpop.f32.mrf.mxu2 }
  0xab   :  { %v225_v20 = vadd.f32 %v224_v19, %v171_v17 }
  0xad   :  { %v264_v22 = vadd.f32 %v263_v21, %v225_v20 }
  0xc0   :  { %v332_v23 = vpop.f32.mrf.mxu0 }
  0xc1   :  { %v333_v24 = vadd.f32 %v332_v23, %v264_v22 }
  0xc8   :  { %v369_v25 = vpop.f32.mrf.mxu1 }
  0xc9   :  { %v370_v27 = vadd.f32 %v369_v25, %v333_v24 }
  0xcb   :  { %v372_v28 = vmax.f32 %v370_v27, 0.0 }
  0xcd   :  { %v376_v29 = vsel %vm374_vm1, %v372_v28, 0 }
  0xce   :  { %v399_v33 = vand.u32 4294901760, %v376_v29 }
  0xd0   :  { %v400_v34 = vsub.f32 %v376_v29, %v399_v33  ;;  %430 = vmatmul.f32.vlgmr.msrb.gmra.mxu3 %v399_v33 }
  0xd1   :  { %522 = vmatpush.msrb.mxu3 %v397_v5 }
  0xd2   :  { %v401_v35 = vand.u32 4294901760, %v400_v34 }
  0xd4   :  { %v402_v40 = vsub.f32 %v400_v34, %v401_v35 }
  0xd6   :  { %v403_v41 = vand.u32 4294901760, %v402_v40 }
  0xd8   :  { %404 = vmatmul.f32.vlgmr.msrb.gmra.mxu2 %v403_v41  ;;  %478 = vmatmul.f32.vlgmr.msra.gmra.mxu3 %v401_v35 }
  0xd9   :  { %500 = vmatpush.msrb.mxu2 %v425_v10 }
  0xe0   :  { %454 = vmatmul.f32.vlgmr.msra.gmra.mxu2 %v400_v34  ;;  %524 = vmatmul.f32.vlgmr.msrb.gmra.mxu3 %v399_v33 }
  0xe8   :  { %502 = vmatmul.f32.vlgmr.msrb.gmra.mxu2 %v399_v33 }
 0x153   :  { %v431_v45 = vpop.f32.mrf.mxu3 }
 0x15b   :  { %v405_v46 = vpop.f32.mrf.mxu2  ;;  %v479_v50 = vpop.f32.mrf.mxu3 }
 0x15c   :  { %v432_v52 = vadd.f32 %v431_v45, %v405_v46 }
 0x163   :  { %v455_v51 = vpop.f32.mrf.mxu2  ;;  %v525_v63 = vpop.f32.mrf.mxu3 }
 0x164   :  { %v456_v54 = vadd.f32 %v455_v51, %v432_v52 }
 0x166   :  { %v480_v57 = vadd.f32 %v479_v50, %v456_v54 }
 0x16b   :  { %v503_v58 = vpop.f32.mrf.mxu2 }
 0x16c   :  { %v504_v62 = vadd.f32 %v503_v58, %v480_v57 }
 0x16e   :  { %v526_v0 = vadd.f32 %v525_v63, %v504_v62 }
 0x170   :  { %v528_v6 = vmax.f32 %v526_v0, 0.0 }
 0x172   :  { %v529_v12 = vmul.f32 %v528_v6, %v730_v7 }
 0x174   :  { %530 = vst [vmem:[%s858_s3] sm:$0xff] %v529_v12 }

</bundles_post_ra>
